<compile_context>
chip_gen: v6e
topology: v6e:2x2x1
jax: 0.10.0
libtpu: 0.0.40
codegen_flags: <defaults>
</compile_context>

<pallas_src>
import functools

import jax
import jax.numpy as jnp
from jax.experimental import pallas as pl
from jax.experimental.pallas import tpu as pltpu


# ----------------------------- Pallas kernels --------------------------------

def linear_feature_student_kernel(x_ref, u_ref, p_ref, o_ref, *, scale):
    """Single invocation: out = ((X @ U) * scale) @ proj.

    x_ref : (B, D)   VMEM
    u_ref : (D, F)   VMEM
    p_ref : (F, S)   VMEM
    o_ref : (B, S)   VMEM
    """
    feat = jnp.dot(x_ref[...], u_ref[...],
                   preferred_element_type=jnp.float32) * scale        # (B, F)
    out = jnp.dot(feat, p_ref[...],
                  preferred_element_type=jnp.float32)                 # (B, S)
    o_ref[...] = out.astype(o_ref.dtype)


def linear_feature_teacher_kernel(x_ref, u_ref, o_ref, *, scale):
    """Teacher path: no projection matmul at all.

    x_ref : (B, D)   VMEM
    u_ref : (D, F)   VMEM
    o_ref : (B, F)   VMEM
    """
    feat = jnp.dot(x_ref[...], u_ref[...],
                   preferred_element_type=jnp.float32) * scale        # (B, F)
    o_ref[...] = feat.astype(o_ref.dtype)


# ------------------------------- wrapper --------------------------------------

def linear_feature_forward(x_in, U, proj, *, teacher=False):
    """phi(X) for the student (teacher=False) or teacher (teacher=True) model."""
    X = x_in.reshape(x_in.shape[0], -1).astype(jnp.float32)   # nn.Flatten()
    B, D = X.shape
    Du, F = U.shape
    assert Du == D, (Du, D)

    scale = float(D) ** (-0.5) * float(F) ** (-0.5)
    vmem = pl.BlockSpec(memory_space=pltpu.MemorySpace.VMEM)

    if teacher:
        kernel = functools.partial(linear_feature_teacher_kernel, scale=scale)
        return pl.pallas_call(
            kernel,
            out_shape=jax.ShapeDtypeStruct((B, F), jnp.float32),
            in_specs=[vmem, vmem],
            out_specs=vmem,
        )(X, U)

    S = proj.shape[1]
    kernel = functools.partial(linear_feature_student_kernel, scale=scale)
    return pl.pallas_call(
        kernel,
        out_shape=jax.ShapeDtypeStruct((B, S), jnp.float32),
        in_specs=[vmem, vmem, vmem],
        out_specs=vmem,
    )(X, U, proj)


# -------------------- deterministic parameter construction -------------------

def generate_matrix(key, input_dim, feat_dim):
    """matrix "U": standard normal, as in the module's torch.randn."""
    return jax.random.normal(key, (input_dim, feat_dim), jnp.float32)


def generate_proj(key, feat_dim, masked_features):
    """proj: column-selection matrix mapping teacher -> student features."""
    student_feat_dim = feat_dim - masked_features
    indices = jnp.sort(jax.random.permutation(key, feat_dim)[:student_feat_dim])
    proj = jnp.zeros((feat_dim, student_feat_dim), jnp.float32)
    proj = proj.at[indices, jnp.arange(student_feat_dim)].set(1.0)
    return proj


# ------------------------------ reference -------------------------------------

def linear_feature_reference(x_in, U, proj, teacher=False):
    X = x_in.reshape(x_in.shape[0], -1).astype(jnp.float32)
    D = X.shape[1]
    F = U.shape[1]
    out = jnp.einsum('bi,im->bm', X, U)
    out = out * (float(D) ** -0.5) * (float(F) ** -0.5)
    if not teacher:
        out = jnp.einsum('bM,Mn->bn', out, proj)
    return out


# -------------------------------- main -----------------------------------------

if __name__ == "__main__":
    B, input_dim, feat_dim, masked = 8, 4, 32, 4      # student_feat_dim = 28

    key = jax.random.PRNGKey(0)
    kx, ku, kp = jax.random.split(key, 3)

    X = jax.random.normal(kx, (B, input_dim), jnp.float32)
    U = generate_matrix(ku, input_dim, feat_dim)            # (D, F)
    proj = generate_proj(kp, feat_dim, masked)              # (F, S)

    # student path
    out_s = linear_feature_forward(X, U, proj, teacher=False)
    out_s = jax.block_until_ready(out_s)
    ref_s = linear_feature_reference(X, U, proj, teacher=False)
    assert out_s.shape == (B, feat_dim - masked), out_s.shape
    assert jnp.allclose(out_s, ref_s, atol=1e-5, rtol=1e-5), \
        float(jnp.max(jnp.abs(out_s - ref_s)))

    # teacher path (no projection matmul in the kernel)
    out_t = linear_feature_forward(X, U, proj, teacher=True)
    out_t = jax.block_until_ready(out_t)
    ref_t = linear_feature_reference(X, U, proj, teacher=True)
    assert out_t.shape == (B, feat_dim), out_t.shape
    assert jnp.allclose(out_t, ref_t, atol=1e-5, rtol=1e-5), \
        float(jnp.max(jnp.abs(out_t - ref_t)))

    print("KERNEL_OK")
</pallas_src>

<mosaic_0001>
module attributes {stable_mosaic.version = 11 : i64} {
  func.func @linear_feature_student_kernel(%arg0: memref<8x4xf32, #tpu.memory_space<vmem>>, %arg1: memref<4x32xf32, #tpu.memory_space<vmem>>, %arg2: memref<32x28xf32, #tpu.memory_space<vmem>>, %arg3: memref<8x28xf32, #tpu.memory_space<vmem>>) attributes {dimension_semantics = [], scalar_prefetch = 0 : i64, scratch_operands = 0 : i64, tpu.core_type = #tpu.core_type<tc>} {
    %c0 = arith.constant 0 : index
    %c0_0 = arith.constant 0 : index
    %0 = vector.load %arg0[%c0, %c0_0] : memref<8x4xf32, #tpu.memory_space<vmem>>, vector<8x4xf32>
    %c0_1 = arith.constant 0 : index
    %c0_2 = arith.constant 0 : index
    %1 = vector.load %arg1[%c0_1, %c0_2] : memref<4x32xf32, #tpu.memory_space<vmem>>, vector<4x32xf32>
    %cst = arith.constant dense<0.000000e+00> : vector<8x32xf32>
    %2 = tpu.matmul %0, %1, %cst {dimension_numbers = #tpu.dot_dimension_numbers<[1], [0], [0], [1], [0, 0, 1, 1], [], []>} : vector<8x4xf32>, vector<4x32xf32>, vector<8x32xf32> -> vector<8x32xf32>
    %cst_3 = arith.constant 0.0883883461 : f32
    %3 = vector.broadcast %cst_3 : f32 to vector<8x32xf32>
    %4 = arith.mulf %2, %3 : vector<8x32xf32>
    %c0_4 = arith.constant 0 : index
    %c0_5 = arith.constant 0 : index
    %5 = vector.load %arg2[%c0_4, %c0_5] : memref<32x28xf32, #tpu.memory_space<vmem>>, vector<32x28xf32>
    %cst_6 = arith.constant dense<0.000000e+00> : vector<8x28xf32>
    %6 = tpu.matmul %4, %5, %cst_6 {dimension_numbers = #tpu.dot_dimension_numbers<[1], [0], [0], [1], [0, 0, 1, 1], [], []>} : vector<8x32xf32>, vector<32x28xf32>, vector<8x28xf32> -> vector<8x28xf32>
    %c0_7 = arith.constant 0 : index
    %c0_8 = arith.constant 0 : index
    %7 = vector.load %arg3[%c0_7, %c0_8] : memref<8x28xf32, #tpu.memory_space<vmem>>, vector<8x28xf32>
    tpu.vector_store %arg3[%c0_7, %c0_8], %6 {strides = array<i32>} : memref<8x28xf32, #tpu.memory_space<vmem>>, vector<8x28xf32>,
    return
  }
}

</mosaic_0001>

<bundles_post_ra>
// kernel: tpu_custom_call.1
= control target key start
LH: loop header
LB: loop body
LE: loop exit
PB: predicated region body
PF: predicated region fallthrough
CT: control target
= control target key end

     0   :  { %8 = vsyncpa [#allocation3], 0  ;;  %s319_s0 = inlined_call_operand.vmem [shape: f32[8,4], index: 0, kind: input, shape index: {}]   ;;  %s320_s1 = inlined_call_operand.vmem [shape: f32[4,32], index: 1, kind: input, shape index: {}]   ;;  %s321_s2 = inlined_call_operand.hbm [shape: f32[32,28], index: 2, kind: input, shape index: {}]   ;;  %s322_s3 = inlined_call_operand.hbm [shape: f32[8,28], index: 3, kind: output, shape index: {}]  }
   0x1   :  { %9 = vsyncpa [#allocation4], 0  ;;  %s281_s12 = smov [#allocation2]  }
   0x2   :  { %s19_s13 = sshll.u32 %s281_s12, 4  ;;  %s20_s13 = int_to_ptr.vmem [resolvable:$true] %s19_s13 }
   0x3   :  { %s245_s14 = scalar_lea.vmem %s20_s13, 512  ;;  %p250_p1 = scmp.lt.s32.totalorder %s20_s13, %s20_s13 }
   0x4   :  { %p246_p0 = scmp.ne.s32.totalorder %s20_s13, %s245_s14  ;;  %p251_p2 = scmp.lt.s32.totalorder %s245_s14, %s245_s14 }
   0x6   :  { %p252_p3 = por %p251_p2, %p250_p1 }
   0x8   :  { %p253_p4 = pnand %p252_p3, %p246_p0 }
   0xa   :  { %256 = shalt.err (!%p253_p4)
}
   0xb   :  { %s282_s15 = smov 128   ;;  %s283_s16 = smov 8  }
   0xc   :  { %25 = dma.hbm_to_vmem [thread:$0]  %s321_s2, 512, %s20_s13, [#allocation3], %s282_s15, %s282_s15, %s283_s16  }
   0xd   :  { %277 = dma.done.wait [#allocation3], 512  }
   0xe   :  { %278 = vsyncadd [#allocation3], 4294966784  ;;  %v284_v0 = vmov 0.0   ;;  %vm285_vm0 = vmmov 0   ;;  %vm35_vm1 = vcmask 1043456   ;;  %vm31_vm2 = vcmask 31744  }
   0xf   :  { %215 = vmatprep.subr.mxu0 %v284_v0  ;;  %217 = vmatprep.mubr.msk.f32.mxu0 %vm285_vm0, %v284_v0  ;;  %v30_v1 = vld [vmem:[%s320_s1] sm:$0xf]  ;;  %v113_v3 = vld [vmem:[#allocation2 + $0x18] sm:$0xff]  ;;  %v112_v4 = vld [vmem:[#allocation2 + $0x10] sm:$0xff]  ;;  %vm114_vm3 = vcmask 261120   ;;  %s286_s1 = smov [#allocation5]  }
  0x10   :  { %220 = vmatprep.subr.mxu1 %v284_v0  ;;  %228 = vmatprep.mubr.msk.f32.mxu1 %vm285_vm0, %v284_v0  ;;  %v29_v2 = vld [vmem:[%s319_s0] sm:$0xff]  ;;  %v111_v5 = vld [vmem:[#allocation2 + $0x8] sm:$0xff]  ;;  %s196_s0 = sshll.u32 %s286_s1, 4  ;;  %vm188_vm4 = vcmask 228352   ;;  %s197_s0 = int_to_ptr.vmem [resolvable:$true] %s196_s0 }
  0x11   :  { %216 = vmatpush3.msk.msra.mxu0 %vm35_vm1, %v30_v1  ;;  %221 = vmatpush3.msra.mxu1 %v113_v3  ;;  %v110_v6 = vld [vmem:[#allocation2] sm:$0xff]  ;;  %s257_s2 = scalar_lea.vmem %s197_s0, 128  ;;  %p262_p6 = scmp.lt.s32.totalorder %s197_s0, %s197_s0 }
  0x12   :  { %218 = vmatmul.mubr.msk.f32.vlgmr.msra.gmra.mxu0 %vm31_vm2, %v29_v2  ;;  %222 = vmatprep.subr.mxu1 %v284_v0  ;;  %p258_p5 = scmp.ne.s32.totalorder %s197_s0, %s257_s2  ;;  %p263_p7 = scmp.lt.s32.totalorder %s257_s2, %s257_s2 }
  0x13   :  { %223 = vmatpush3.msra.mxu1 %v112_v4 }
  0x14   :  { %224 = vmatprep.subr.mxu1 %v284_v0  ;;  %p264_p8 = por %p263_p7, %p262_p6 }
  0x15   :  { %225 = vmatpush3.msra.mxu1 %v111_v5 }
  0x16   :  { %226 = vmatprep.subr.mxu1 %v284_v0  ;;  %p265_p9 = pnand %p264_p8, %p258_p5 }
  0x17   :  { %227 = vmatpush3.msra.mxu1 %v110_v6 }
  0xd2   :  { %v105_v7 = vpop.f32.mrf.mxu0 }
  0xd3   :  { %v109_v8 = vmul.f32 0.088388346, %v105_v7 }
  0xd4   :  { %v219_v9 = vpop.f32.mrf.mxu0 }
  0xd5   :  { %229 = vmatmul.mubr.msk.f32.vlgmr.msra.gmra.mxu1 %vm114_vm3, %v109_v8 }
 0x195   :  { %v184_v10 = vpop.f32.mrf.mxu1 }
 0x196   :  { %189 = vst.msk [vmem:[#allocation5] sm:$0xff] %vm188_vm4, %v184_v10 }
 0x197   :  { %v230_v11 = vpop.f32.mrf.mxu1 }
 0x198   :  { %268 = shalt.err (!%p265_p9)
}
 0x199   :  { %199 = dma.vmem_to_hbm [thread:$0]  %s197_s0, 128, %s322_s3, [#allocation4]  }
 0x19a   :  { %279 = dma.done.wait [#allocation4], 128  }
 0x19b   :  { %280 = vsyncadd [#allocation4], 4294967168 }
 0x19c   :  { %203 = vsyncpa [#allocation3], 1 }
 0x19d   :  { %204 = vsyncpa [#allocation4], 1 }

</bundles_post_ra>
